<compile_context>
chip_gen: v7x
topology: tpu7x:2x2x1
jax: 0.10.0
libtpu: 0.0.40
codegen_flags: <defaults>
</compile_context>

<pallas_src>
import jax
import jax.numpy as jnp
from jax.experimental import pallas as pl
from jax.experimental.pallas import tpu as pltpu


def _classifier_kernel(x_ref, w1_ref, b1_ref, w2_ref, b2_ref, o_ref):
    # Layer 1: MXU matmul, f32 accumulation.
    h = jnp.dot(x_ref[...], w1_ref[...], preferred_element_type=jnp.float32)
    # Bias-add + ReLU on the VPU (b1 is (1, D) -> broadcasts over rows).
    h = jnp.maximum(h + b1_ref[...], 0.0)
    # Layer 2: MXU matmul, f32 accumulation.
    out = jnp.dot(h.astype(w2_ref.dtype), w2_ref[...],
                  preferred_element_type=jnp.float32)
    o_ref[...] = (out + b2_ref[...]).astype(o_ref.dtype)


def classifier_forward(x, w1, b1, w2, b2, *, tile_b=4096):
    """Forward pass of Classifier.

    x  : [B, 128]
    w1 : [128, 128]        (stored as [in, out] = PyTorch Linear.weight.T)
    b1 : [128]
    w2 : [128, nclasses]   (stored as [in, out])
    b2 : [nclasses]
    returns [B, nclasses] float32 logits

    x / w1 / w2 should share a dtype (f32 here; pass bf16 tensors for bf16
    streaming).  No padding or casting is done in this wrapper.
    """
    B, D = x.shape
    C = w2.shape[1]

    # Tile selection:
    #  - small batch: one un-padded step covering all of B (block dim == full dim
    #    is always legal, even if B is not a multiple of 8).
    #  - large batch: tile_b rows per step (multiple of 8); the last block may be
    #    partial — Pallas masks the out-of-range rows, no wrapper-side zero-fill.
    if B <= tile_b:
        tile_b = B
    grid = (pl.cdiv(B, tile_b),)

    # Biases as (1, N) rows for in-kernel broadcasting (metadata-only reshape).
    b1_2d = jnp.reshape(jnp.asarray(b1), (1, D))
    b2_2d = jnp.reshape(jnp.asarray(b2), (1, C))

    # Advisory cost hint for XLA's scheduler around the custom call.
    x_bytes = x.size * jnp.dtype(x.dtype).itemsize
    w_bytes = (w1.size * jnp.dtype(w1.dtype).itemsize
               + w2.size * jnp.dtype(w2.dtype).itemsize
               + (D + C) * 4)
    cost = pl.CostEstimate(
        flops=2 * B * D * (D + C),
        transcendentals=0,
        bytes_accessed=x_bytes + w_bytes + B * C * 4,
    )

    out = pl.pallas_call(
        _classifier_kernel,
        out_shape=jax.ShapeDtypeStruct((B, C), jnp.float32),
        grid=grid,
        in_specs=[
            pl.BlockSpec((tile_b, D), lambda i: (i, 0)),   # x: streamed per tile
            pl.BlockSpec((D, D),      lambda i: (0, 0)),   # w1: resident
            pl.BlockSpec((1, D),      lambda i: (0, 0)),   # b1: resident
            pl.BlockSpec((D, C),      lambda i: (0, 0)),   # w2: resident
            pl.BlockSpec((1, C),      lambda i: (0, 0)),   # b2: resident
        ],
        out_specs=pl.BlockSpec((tile_b, C), lambda i: (i, 0)),
        compiler_params=pltpu.CompilerParams(
            # v7x: shard batch tiles across its 2 TensorCores (no-op on v5e/v6e).
            dimension_semantics=("parallel",),
            # 2x double-buffered x tiles (4096*128*4 B = 2 MiB each) + 2x small
            # output tiles + ~70 KiB resident weights << 32 MiB; explicit limit
            # keeps the tiling portable (v5e default scoped is only 16 MiB,
            # v7x physical VMEM is 64 MiB).
            vmem_limit_bytes=32 * 1024 * 1024,
        ),
        cost_estimate=cost,
    )(x, w1, b1_2d, w2, b2_2d)

    return out


def reference_forward_f32(x, w1, b1, w2, b2):
    """Pure-f32 reference matching PyTorch nn.Linear semantics."""
    hp = jax.lax.Precision.HIGHEST
    h = jnp.maximum(
        jnp.dot(x, w1, precision=hp) + b1.reshape(1, -1), 0.0)
    return jnp.dot(h, w2, precision=hp) + b2.reshape(1, -1)


if __name__ == "__main__":
    B = 8            # batch
    D = 2 * 64       # = 128, input / hidden width from the module definition
    NCLASSES = 10

    key = jax.random.PRNGKey(0)
    kx, kw1, kb1, kw2, kb2 = jax.random.split(key, 5)

    # Deterministic, PyTorch-Linear-like uniform init (bound = 1/sqrt(fan_in)).
    bound = 1.0 / (D ** 0.5)
    x = jax.random.normal(kx, (B, D), dtype=jnp.float32)
    # Weights stored as [in_features, out_features] (i.e. W.T of the PyTorch layer).
    w1 = jax.random.uniform(kw1, (D, D), minval=-bound, maxval=bound, dtype=jnp.float32)
    b1 = jax.random.uniform(kb1, (D,),   minval=-bound, maxval=bound, dtype=jnp.float32)
    w2 = jax.random.uniform(kw2, (D, NCLASSES), minval=-bound, maxval=bound, dtype=jnp.float32)
    b2 = jax.random.uniform(kb2, (NCLASSES,),   minval=-bound, maxval=bound, dtype=jnp.float32)

    out = classifier_forward(x, w1, b1, w2, b2)
    jax.block_until_ready(out)
    assert out.shape == (B, NCLASSES)

    ref = reference_forward_f32(x, w1, b1, w2, b2)
    max_err = float(jnp.max(jnp.abs(out - ref)))
    assert jnp.allclose(out, ref, atol=1e-2, rtol=1e-2), max_err

    print("KERNEL_OK")
</pallas_src>

<mosaic_0001>
module attributes {stable_mosaic.version = 11 : i64} {
  func.func @_classifier_kernel(%arg0: i32, %arg1: memref<8x128xf32, #tpu.memory_space<vmem>>, %arg2: memref<128x128xf32, #tpu.memory_space<vmem>>, %arg3: memref<1x128xf32, #tpu.memory_space<vmem>>, %arg4: memref<128x10xf32, #tpu.memory_space<vmem>>, %arg5: memref<1x10xf32, #tpu.memory_space<vmem>>, %arg6: memref<8x10xf32, #tpu.memory_space<vmem>>) attributes {dimension_semantics = [#tpu.dimension_semantics<parallel>], iteration_bounds = array<i64: 1>, scalar_prefetch = 0 : i64, scratch_operands = 0 : i64, tpu.core_type = #tpu.core_type<tc>, window_params = [{transform_indices = @transform_0, window_bounds = array<i64: 8, 128>}, {pipeline_mode = #tpu.pipeline_mode<synchronous>, transform_indices = @transform_1, window_bounds = array<i64: 128, 128>}, {pipeline_mode = #tpu.pipeline_mode<synchronous>, transform_indices = @transform_2, window_bounds = array<i64: 1, 128>}, {pipeline_mode = #tpu.pipeline_mode<synchronous>, transform_indices = @transform_3, window_bounds = array<i64: 128, 10>}, {pipeline_mode = #tpu.pipeline_mode<synchronous>, transform_indices = @transform_4, window_bounds = array<i64: 1, 10>}, {transform_indices = @transform_5, window_bounds = array<i64: 8, 10>}]} {
    %c0 = arith.constant 0 : index
    %c0_0 = arith.constant 0 : index
    %0 = vector.load %arg1[%c0, %c0_0] : memref<8x128xf32, #tpu.memory_space<vmem>>, vector<8x128xf32>
    %c0_1 = arith.constant 0 : index
    %c0_2 = arith.constant 0 : index
    %1 = vector.load %arg2[%c0_1, %c0_2] : memref<128x128xf32, #tpu.memory_space<vmem>>, vector<128x128xf32>
    %cst = arith.constant dense<0.000000e+00> : vector<8x128xf32>
    %2 = tpu.matmul %0, %1, %cst {dimension_numbers = #tpu.dot_dimension_numbers<[1], [0], [0], [1], [0, 0, 1, 1], [], []>} : vector<8x128xf32>, vector<128x128xf32>, vector<8x128xf32> -> vector<8x128xf32>
    %c0_3 = arith.constant 0 : index
    %c0_4 = arith.constant 0 : index
    %3 = vector.load %arg3[%c0_3, %c0_4] : memref<1x128xf32, #tpu.memory_space<vmem>>, vector<1x128xf32>
    %4 = vector.broadcast %3 : vector<1x128xf32> to vector<8x128xf32>
    %5 = arith.addf %2, %4 : vector<8x128xf32>
    %cst_5 = arith.constant 0.000000e+00 : f32
    %6 = vector.broadcast %cst_5 : f32 to vector<8x128xf32>
    %7 = arith.maximumf %5, %6 : vector<8x128xf32>
    %c0_6 = arith.constant 0 : index
    %c0_7 = arith.constant 0 : index
    %8 = vector.load %arg4[%c0_6, %c0_7] : memref<128x10xf32, #tpu.memory_space<vmem>>, vector<128x10xf32>
    %cst_8 = arith.constant dense<0.000000e+00> : vector<8x10xf32>
    %9 = tpu.matmul %7, %8, %cst_8 {dimension_numbers = #tpu.dot_dimension_numbers<[1], [0], [0], [1], [0, 0, 1, 1], [], []>} : vector<8x128xf32>, vector<128x10xf32>, vector<8x10xf32> -> vector<8x10xf32>
    %c0_9 = arith.constant 0 : index
    %c0_10 = arith.constant 0 : index
    %10 = vector.load %arg5[%c0_9, %c0_10] : memref<1x10xf32, #tpu.memory_space<vmem>>, vector<1x10xf32>
    %11 = vector.broadcast %10 : vector<1x10xf32> to vector<8x10xf32>
    %12 = arith.addf %9, %11 : vector<8x10xf32>
    %c0_11 = arith.constant 0 : index
    %c0_12 = arith.constant 0 : index
    %13 = vector.load %arg6[%c0_11, %c0_12] : memref<8x10xf32, #tpu.memory_space<vmem>>, vector<8x10xf32>
    tpu.vector_store %arg6[%c0_11, %c0_12], %12 {strides = array<i32>} : memref<8x10xf32, #tpu.memory_space<vmem>>, vector<8x10xf32>,
    return
  }
  func.func @transform_0(%arg0: i32) -> (i32, i32) {
    %c0_i32 = arith.constant 0 : i32
    %c0_i32_0 = arith.constant 0 : i32
    return %arg0, %c0_i32 : i32, i32
  }
  func.func @transform_1(%arg0: i32) -> (i32, i32) {
    %c0_i32 = arith.constant 0 : i32
    %c0_i32_0 = arith.constant 0 : i32
    %c0_i32_1 = arith.constant 0 : i32
    return %c0_i32, %c0_i32_0 : i32, i32
  }
  func.func @transform_2(%arg0: i32) -> (i32, i32) {
    %c0_i32 = arith.constant 0 : i32
    %c0_i32_0 = arith.constant 0 : i32
    %c0_i32_1 = arith.constant 0 : i32
    return %c0_i32, %c0_i32_0 : i32, i32
  }
  func.func @transform_3(%arg0: i32) -> (i32, i32) {
    %c0_i32 = arith.constant 0 : i32
    %c0_i32_0 = arith.constant 0 : i32
    %c0_i32_1 = arith.constant 0 : i32
    return %c0_i32, %c0_i32_0 : i32, i32
  }
  func.func @transform_4(%arg0: i32) -> (i32, i32) {
    %c0_i32 = arith.constant 0 : i32
    %c0_i32_0 = arith.constant 0 : i32
    %c0_i32_1 = arith.constant 0 : i32
    return %c0_i32, %c0_i32_0 : i32, i32
  }
  func.func @transform_5(%arg0: i32) -> (i32, i32) {
    %c0_i32 = arith.constant 0 : i32
    %c0_i32_0 = arith.constant 0 : i32
    return %arg0, %c0_i32 : i32, i32
  }
}

</mosaic_0001>

<bundles_post_ra>
// kernel: tpu_custom_call.1
= control target key start
LH: loop header
LB: loop body
LE: loop exit
PB: predicated region body
PF: predicated region fallthrough
CT: control target
= control target key end

     0   :  { %v407_v3 = vmov 0.0|0.0   ;;  %vm408_vm0 = vmmov 0   ;;  %v409_v6 = vmov 0.0   ;;  %s574_s0 = inlined_call_operand.vmem [shape: f32[8,128], index: 0, kind: input, shape index: {}]   ;;  %s575_s1 = inlined_call_operand.vmem [shape: f32[128,128], index: 1, kind: input, shape index: {}]   ;;  %s576_s2 = inlined_call_operand.vmem [shape: f32[1,128], index: 2, kind: input, shape index: {}]   ;;  %s577_s3 = inlined_call_operand.vmem [shape: f32[128,10], index: 3, kind: input, shape index: {}]   ;;  %s578_s4 = inlined_call_operand.vmem [shape: f32[1,10], index: 4, kind: input, shape index: {}]   ;;  %s579_s5 = inlined_call_operand.hbm [shape: f32[8,10], index: 5, kind: output, shape index: {}]  }
   0x1   :  { %v22_v0 = vld [vmem:[%s575_s1] sm:$0xff]  ;;  %v23_v1 = vld [vmem:[%s575_s1 + $0x8] sm:$0xff]  ;;  %v24_v2 = vld [vmem:[%s575_s1 + $0x10] sm:$0xff]  ;;  %331 = vmatprep.subr.bf16.mxu0 %v407_v3  ;;  %293 = vmatprep.mubr.msk.f32.mxu0 %vm408_vm0, %v409_v6 }
   0x2   :  { %v332_v4 = vpack.c.bf16 %v23_v1, %v22_v0  ;;  %v25_v5 = vld [vmem:[%s575_s1 + $0x18] sm:$0xff]  ;;  %355 = vmatprep.subr.bf16.mxu1 %v407_v3  ;;  %328 = vmatprep.mubr.msk.f32.mxu1 %vm408_vm0, %v409_v6  ;;  %v26_v8 = vld [vmem:[%s575_s1 + $0x20] sm:$0xff]  ;;  %v27_v9 = vld [vmem:[%s575_s1 + $0x28] sm:$0xff] }
   0x3   :  { %v335_v7 = vpack.c.bf16 %v25_v5, %v24_v2  ;;  %v116_v10 = vld [vmem:[%s577_s3] sm:$0xff]  ;;  %v117_v11 = vld [vmem:[%s577_s3 + $0x8] sm:$0xff]  ;;  %v118_v12 = vld [vmem:[%s577_s3 + $0x10] sm:$0xff]  ;;  %v338_v14 = vpack.c.bf16 %v27_v9, %v26_v8 }
   0x4   :  { %333 = vmatpush3.bf16.msra.mxu0 %v332_v4  ;;  %v119_v13 = vld [vmem:[%s577_s3 + $0x18] sm:$0xff]  ;;  %v356_v15 = vpack.c.bf16 %v117_v11, %v116_v10  ;;  %v28_v16 = vld [vmem:[%s575_s1 + $0x30] sm:$0xff]  ;;  %v120_v19 = vld [vmem:[%s577_s3 + $0x20] sm:$0xff] }
   0x5   :  { %334 = vmatprep.subr.bf16.mxu0 %v407_v3  ;;  %v29_v17 = vld [vmem:[%s575_s1 + $0x38] sm:$0xff]  ;;  %v359_v18 = vpack.c.bf16 %v119_v13, %v118_v12  ;;  %v121_v20 = vld [vmem:[%s577_s3 + $0x28] sm:$0xff] }
   0x6   :  { %357 = vmatpush3.bf16.msra.mxu1 %v356_v15 }
   0x7   :  { %358 = vmatprep.subr.bf16.mxu1 %v407_v3 }
   0x8   :  { %336 = vmatpush3.bf16.msra.mxu0 %v335_v7 }
   0x9   :  { %337 = vmatprep.subr.bf16.mxu0 %v407_v3 }
   0xa   :  { %10 = vsyncpa [#allocation3], 0  ;;  %v341_v21 = vpack.c.bf16 %v29_v17, %v28_v16  ;;  %v30_v22 = vld [vmem:[%s575_s1 + $0x40] sm:$0xff]  ;;  %v31_v23 = vld [vmem:[%s575_s1 + $0x48] sm:$0xff]  ;;  %360 = vmatpush3.bf16.msra.mxu1 %v359_v18  ;;  %v362_v24 = vpack.c.bf16 %v121_v20, %v120_v19  ;;  %s410_s11 = smov [#allocation2]   ;;  %vm209_vm1 = vcmask 80896  }
   0xb   :  { %361 = vmatprep.subr.bf16.mxu1 %v407_v3  ;;  %v122_v25 = vld [vmem:[%s577_s3 + $0x30] sm:$0xff]  ;;  %v123_v26 = vld [vmem:[%s577_s3 + $0x38] sm:$0xff]  ;;  %v344_v27 = vpack.c.bf16 %v31_v23, %v30_v22  ;;  %v124_v31 = vld [vmem:[%s577_s3 + $0x40] sm:$0xff]  ;;  %s217_s12 = sshll.u32 %s410_s11, 4  ;;  %s218_s12 = int_to_ptr.vmem [resolvable:$true] %s217_s12 }
   0xc   :  { %339 = vmatpush3.bf16.msra.mxu0 %v338_v14  ;;  %v32_v28 = vld [vmem:[%s575_s1 + $0x50] sm:$0xff]  ;;  %v33_v29 = vld [vmem:[%s575_s1 + $0x58] sm:$0xff]  ;;  %v365_v30 = vpack.c.bf16 %v123_v26, %v122_v25  ;;  %v125_v32 = vld [vmem:[%s577_s3 + $0x48] sm:$0xff]  ;;  %p388_p1 = scmp.lt.s32.totalorder %s218_s12, %s218_s12 }
   0xd   :  { %340 = vmatprep.subr.bf16.mxu0 %v407_v3  ;;  %v347_v33 = vpack.c.bf16 %v33_v29, %v32_v28  ;;  %v34_v34 = vld [vmem:[%s575_s1 + $0x60] sm:$0xff]  ;;  %v35_v35 = vld [vmem:[%s575_s1 + $0x68] sm:$0xff]  ;;  %v368_v36 = vpack.c.bf16 %v125_v32, %v124_v31  ;;  %v126_v37 = vld [vmem:[%s577_s3 + $0x50] sm:$0xff] }
   0xe   :  { %363 = vmatpush3.bf16.msra.mxu1 %v362_v24  ;;  %v127_v38 = vld [vmem:[%s577_s3 + $0x58] sm:$0xff]  ;;  %v350_v39 = vpack.c.bf16 %v35_v35, %v34_v34  ;;  %v36_v40 = vld [vmem:[%s575_s1 + $0x70] sm:$0xff]  ;;  %v128_v43 = vld [vmem:[%s577_s3 + $0x60] sm:$0xff] }
   0xf   :  { %364 = vmatprep.subr.bf16.mxu1 %v407_v3  ;;  %v37_v41 = vld [vmem:[%s575_s1 + $0x78] sm:$0xff]  ;;  %v371_v42 = vpack.c.bf16 %v127_v38, %v126_v37  ;;  %v129_v44 = vld [vmem:[%s577_s3 + $0x68] sm:$0xff]  ;;  %v21_v47 = vld [vmem:[%s574_s0] sm:$0xff] }
  0x10   :  { %342 = vmatpush3.bf16.msra.mxu0 %v341_v21  ;;  %v353_v45 = vpack.c.bf16 %v37_v41, %v36_v40  ;;  %v374_v46 = vpack.c.bf16 %v129_v44, %v128_v43  ;;  %v130_v48 = vld [vmem:[%s577_s3 + $0x70] sm:$0xff]  ;;  %v131_v49 = vld [vmem:[%s577_s3 + $0x78] sm:$0xff]  ;;  %v225_v51 = vld [vmem:[%s576_s2] ss:$0 sm:$0xff]  ;;  %s383_s3 = scalar_lea.vmem %s218_s12, 128 }
  0x11   :  { %343 = vmatprep.subr.bf16.mxu0 %v407_v3  ;;  %v377_v50 = vpack.c.bf16 %v131_v49, %v130_v48  ;;  %v226_v56 = vld [vmem:[%s578_s4] ss:$0 sm:$0xff]  ;;  %p384_p0 = scmp.ne.s32.totalorder %s218_s12, %s383_s3  ;;  %p389_p2 = scmp.lt.s32.totalorder %s383_s3, %s383_s3 }
  0x12   :  { %366 = vmatpush3.bf16.msra.mxu1 %v365_v30 }
  0x13   :  { %367 = vmatprep.subr.bf16.mxu1 %v407_v3  ;;  %p390_p3 = por %p389_p2, %p388_p1 }
  0x14   :  { %345 = vmatpush3.bf16.msra.mxu0 %v344_v27 }
  0x15   :  { %346 = vmatprep.subr.bf16.mxu0 %v407_v3  ;;  %p391_p4 = pnand %p390_p3, %p384_p0 }
  0x16   :  { %369 = vmatpush3.bf16.msra.mxu1 %v368_v36 }
  0x17   :  { %370 = vmatprep.subr.bf16.mxu1 %v407_v3 }
  0x18   :  { %348 = vmatpush3.bf16.msra.mxu0 %v347_v33 }
  0x19   :  { %349 = vmatprep.subr.bf16.mxu0 %v407_v3 }
  0x1a   :  { %372 = vmatpush3.bf16.msra.mxu1 %v371_v42 }
  0x1b   :  { %373 = vmatprep.subr.bf16.mxu1 %v407_v3 }
  0x1c   :  { %351 = vmatpush3.bf16.msra.mxu0 %v350_v39 }
  0x1d   :  { %352 = vmatprep.subr.bf16.mxu0 %v407_v3 }
  0x1e   :  { %375 = vmatpush3.bf16.msra.mxu1 %v374_v46 }
  0x1f   :  { %376 = vmatprep.subr.bf16.mxu1 %v407_v3 }
  0x20   :  { %354 = vmatpush3.bf16.msra.mxu0 %v353_v45 }
  0x22   :  { %378 = vmatpush3.bf16.msra.mxu1 %v377_v50 }
  0x23   :  { %294 = vmatmul.mubr.f32.vlgmr.msra.gmra.mrb[0].mxu0 %v21_v47 }
  0xf6   :  { %v111_v52 = vpop.f32.mrb[0].mxu0 }
  0xf7   :  { %v112_v53 = vadd.f32 %v225_v51, %v111_v52  ;;  %v295_v54 = vpop.f32.mrb[1].mxu0 }
  0xf9   :  { %v115_v55 = vmax.f32 %v112_v53, 0.0 }
  0xfb   :  { %329 = vmatmul.mubr.f32.vlgmr.msra.gmra.mrb[0].mxu1 %v115_v55 }
 0x1ce   :  { %v205_v57 = vpop.f32.mrb[0].mxu1 }
 0x1cf   :  { %v206_v58 = vadd.f32 %v226_v56, %v205_v57  ;;  %v330_v59 = vpop.f32.mrb[1].mxu1 }
 0x1d1   :  { %210 = vst.msk [vmem:[#allocation2] sm:$0xff] %vm209_vm1, %v206_v58 }
 0x1d2   :  { %394 = shalt.err (!%p391_p4)
}
 0x1d3   :  { %s395_s14 = scalar_lea.hbm %s579_s5, 128 }
 0x1d4   :  { %p396_p5 = scmp.ne.s32.totalorder %s579_s5, %s395_s14  ;;  %p399_p6 = scmp.lt.u32.totalorder %s395_s14, %s579_s5 }
 0x1d6   :  { %p401_p7 = pnand %p399_p6, %p396_p5 }
 0x1d8   :  { %404 = shalt.err (!%p401_p7)
}
 0x1d9   :  { %220 = dma.vmem_to_hbm [thread:$0]  %s218_s12, 128, %s579_s5, [#allocation3]  }
 0x1da   :  { %405 = dma.done.wait [#allocation3], 128  }
 0x1db   :  { %406 = vsyncadd [#allocation3], 4294967168 }
 0x1dc   :  { %224 = vsyncpa [#allocation3], 1 }

</bundles_post_ra>
